<compile_context>
chip_gen: v6e
topology: v6e:2x2x1
jax: 0.10.0
libtpu: 0.0.40
codegen_flags: <defaults>
</compile_context>

<pallas_src>
import functools

import numpy as np

import jax
import jax.numpy as jnp
from jax.experimental import pallas as pl
from jax.experimental.pallas import tpu as pltpu


def _round_up(v, m):
    return (v + m - 1) // m * m


def _cdiv(a, b):
    return (a + b - 1) // b


def _pad2(a, shape):
    a = jnp.asarray(a)
    pads = [(0, t - s) for s, t in zip(a.shape, shape)]
    return jnp.pad(a, pads)


def _gnn_kernel(depth, n_valid, tile_n, tiles_per_split, mxu_dtype, need_mask,
                *refs):
    """One node-tile of the MLP + per-split column-sum accumulation.

    refs = (x_ref,                      # (tile_n, F), f32 or bf16 stream
            W0, ..., W_{depth-1},       # VMEM-resident hidden weights
            biases,                     # (depth, w_pad) f32, packed
            out_ref)                    # (8, w_pad) per-split partial sums
    """
    x_ref = refs[0]
    w_refs = refs[1:1 + depth]
    b_ref = refs[1 + depth]
    out_ref = refs[2 + depth]

    c = pl.program_id(0)          # split index  ("parallel" -> megacore)
    i = pl.program_id(1)          # node-tile index within split ("arbitrary")

    @pl.when(i == 0)
    def _init():
        out_ref[...] = jnp.zeros_like(out_ref)

    # Hidden stack: Linear -> ReLU, x depth. MXU matmuls accumulate in f32;
    # bias add + ReLU stay in f32 (safe on v5e even with bf16 MXU inputs).
    h = x_ref[...]
    for l in range(depth):
        a = h if h.dtype == mxu_dtype else h.astype(mxu_dtype)
        h = jnp.dot(a, w_refs[l][...], preferred_element_type=jnp.float32)
        h = jnp.maximum(h + b_ref[pl.ds(l, 1), :], 0.0)
        # TODO(synk): nn.Dropout (training mode) not implemented; this matches
        # eval-mode / dropout=False semantics.

    def _accumulate(hv):
        # Per-tile per-column sum (XLU sublane reduce) into row 0 of the
        # resident per-split output tile.
        out_ref[pl.ds(0, 1), :] += jnp.sum(hv, axis=0, keepdims=True)

    if need_mask:
        gt = c * tiles_per_split + i            # global node-tile index
        ragged = (gt + 1) * tile_n > n_valid    # extends past (or beyond) N

        @pl.when(jnp.logical_not(ragged))
        def _acc_full():
            _accumulate(h)

        @pl.when(ragged)
        def _acc_masked():
            # Zero rows >= N so garbage in the ragged / clamped-overhang tile
            # (and the layer-0 bias picked up by them) never reaches the mean.
            row = gt * tile_n + jax.lax.broadcasted_iota(
                jnp.int32, (tile_n, 1), 0)
            _accumulate(jnp.where(row < n_valid, h, 0.0))
    else:
        _accumulate(h)


def gnn_forward(x, params, *, tile_n=None, num_splits=2,
                mxu_dtype=jnp.float32, vmem_limit_bytes=None):
    """x: [N, input_dim] f32; params: list of (W [in,out], b [.., out]).

    The last layer must have out_features == 1 (it is folded into the mean).
    mxu_dtype=jnp.bfloat16 streams x and the weights in bf16 (MXU-native on
    v5e/v6e/v7x); accumulation, bias add and ReLU remain f32.
    num_splits > 1 adds a leading "parallel" grid axis (v7x megacore).
    """
    x = jnp.asarray(x, jnp.float32)
    n, f = x.shape
    depth = len(params) - 1                 # hidden Linear+ReLU layers
    width = params[0][0].shape[1]
    assert params[-1][0].shape == (width, 1), "final layer must map width -> 1"

    mxu_dtype = np.dtype(mxu_dtype)
    stream_f32 = mxu_dtype == np.dtype(jnp.float32)
    x_itemsize = 4 if stream_f32 else mxu_dtype.itemsize
    w_pad = _round_up(width, 128)           # lane-dense hidden width

    # Node-row tile: derive from an ~8 MiB double-buffered x budget (>=512
    # rows is near the HBM roofline), aligned to the sublane packing (16 rows
    # for 2-byte streams), capped by the (rounded-up) node count.
    row_align = 8 if x_itemsize == 4 else 16
    if tile_n is None:
        tile_n = (8 * 1024 * 1024) // (2 * max(f, 1) * x_itemsize)
        tile_n = min(tile_n, 2048)
    tile_n = max(row_align,
                 _round_up(min(tile_n, _round_up(n, row_align)), row_align))

    num_tiles = _cdiv(n, tile_n)
    num_splits = max(1, min(num_splits, num_tiles))
    tiles_per_split = _cdiv(num_tiles, num_splits)
    need_mask = num_splits * tiles_per_split * tile_n != n

    # x streams unpadded (and as bf16 when mxu_dtype=bfloat16): no host-side
    # pad pass, minimal HBM traffic on the dominant stream.
    x_in = x if stream_f32 else x.astype(mxu_dtype)

    # Hidden weights zero-padded only on the output (lane) dim — inert through
    # matmul + bias + ReLU; W0 keeps K = F unpadded. Biases packed into one
    # (depth, w_pad) f32 array -> a single constant-index input stream.
    weights = []
    for l in range(depth):
        w = jnp.asarray(params[l][0], jnp.float32)
        in_dim = f if l == 0 else w_pad
        weights.append(_pad2(w, (in_dim, w_pad)).astype(mxu_dtype))
    biases = jnp.stack(
        [jnp.pad(jnp.asarray(b, jnp.float32).reshape(-1), (0, w_pad - width))
         for _, b in params[:depth]], axis=0)                  # (depth, w_pad)

    def x_index_map(c, i):
        gt = c * tiles_per_split + i
        # Clamp split-overhang tiles in-bounds; their rows are fully masked.
        return (jnp.minimum(gt, num_tiles - 1), 0)

    const = lambda c, i: (0, 0)
    in_specs = [pl.BlockSpec((tile_n, f), x_index_map)]
    for l in range(depth):
        in_dim = f if l == 0 else w_pad
        in_specs.append(pl.BlockSpec((in_dim, w_pad), const))
    in_specs.append(pl.BlockSpec((depth, w_pad), const))

    # VMEM budget from actual footprint: double-buffered x tile + (default
    # double-buffered) resident weights + biases + partial-sum output, with
    # headroom; floor 32 MiB, cap 96 MiB (stays under v5e/v6e physical VMEM;
    # v7x's 64 MiB only matters once tiles/weights actually grow).
    if vmem_limit_bytes is None:
        est = (2 * tile_n * f * x_itemsize
               + 2 * sum(int(np.prod(w.shape)) for w in weights)
                   * mxu_dtype.itemsize
               + 2 * depth * w_pad * 4
               + 2 * 8 * w_pad * 4)
        vmem_limit_bytes = int(min(max(32 << 20, est * 5 // 4 + (4 << 20)),
                                   96 << 20))

    kernel = functools.partial(_gnn_kernel, depth, n, tile_n, tiles_per_split,
                               mxu_dtype, need_mask)

    partial_sums = pl.pallas_call(
        kernel,
        out_shape=jax.ShapeDtypeStruct((8 * num_splits, w_pad), jnp.float32),
        grid_spec=pltpu.PrefetchScalarGridSpec(
            num_scalar_prefetch=0,
            grid=(num_splits, tiles_per_split),
            in_specs=in_specs,
            out_specs=pl.BlockSpec((8, w_pad), lambda c, i: (c, 0)),
        ),
        compiler_params=pltpu.CompilerParams(
            # Leading split axis is parallel (engages both v7x TCs); the inner
            # node-tile axis carries the per-split accumulator -> arbitrary.
            dimension_semantics=("parallel", "arbitrary"),
            vmem_limit_bytes=vmem_limit_bytes,
        ),
    )(x_in, *weights, biases)

    # Tiny epilogue in plain JAX: combine per-split partial sums and fold the
    # final Linear(width,1) + mean, since
    #     mean(h @ W_last + b_last) == mean(h, axis=0) @ W_last + b_last.
    col_sum = jnp.sum(partial_sums, axis=0)[:width]
    w_last = jnp.asarray(params[-1][0], jnp.float32).reshape(-1)
    b_last = jnp.asarray(params[-1][1], jnp.float32).reshape(())
    return jnp.dot(col_sum / n, w_last) + b_last


def init_gnn_params(key, input_dim, depth, width):
    """Deterministic synthetic init of Linear layers (PyTorch-style fan-in)."""
    dims = [input_dim] + [width] * depth + [1]
    params = []
    for i in range(len(dims) - 1):
        key, kw, kb = jax.random.split(key, 3)
        bound = 1.0 / jnp.sqrt(dims[i])
        w = jax.random.uniform(kw, (dims[i], dims[i + 1]), jnp.float32,
                               minval=-bound, maxval=bound)
        b = jax.random.uniform(kb, (1, dims[i + 1]), jnp.float32,
                               minval=-bound, maxval=bound)
        params.append((w, b))
    return params


def gnn_reference(x, params):
    """Pure-JAX reference matching the PyTorch forward."""
    h = x
    n = len(params)
    for i, (w, b) in enumerate(params):
        h = h @ w + b
        if i < n - 1:
            h = jnp.maximum(h, 0.0)
    return jnp.mean(h)


if __name__ == "__main__":
    # Small shapes consistent with the module: N nodes, input_dim features.
    # N is not a multiple of TILE_N and num_tiles is odd, so the ragged-tile
    # mask, the split-overhang clamp, and the parallel-split combine are all
    # exercised.
    N, INPUT_DIM, DEPTH, WIDTH = 300, 16, 2, 32
    TILE_N = 128

    key = jax.random.PRNGKey(0)
    key, kx = jax.random.split(key)
    x = jax.random.normal(kx, (N, INPUT_DIM), jnp.float32)
    params = init_gnn_params(key, INPUT_DIM, DEPTH, WIDTH)

    ref = gnn_reference(x, params)

    # f32 MXU path, explicit small tile + 2 splits (strict check).
    out = jax.block_until_ready(gnn_forward(x, params, tile_n=TILE_N))
    assert jnp.allclose(out, ref, atol=1e-4, rtol=1e-4), (out, ref)

    # Default auto-sized tile / single-split path (strict check).
    out_def = jax.block_until_ready(gnn_forward(x, params))
    assert jnp.allclose(out_def, ref, atol=1e-4, rtol=1e-4), (out_def, ref)

    # bf16 streaming + bf16 MXU fast path (f32 accumulation — loose check).
    out_bf16 = jax.block_until_ready(
        gnn_forward(x, params, tile_n=TILE_N, mxu_dtype=jnp.bfloat16))
    assert jnp.allclose(out_bf16, ref, atol=5e-2, rtol=5e-2), (out_bf16, ref)

    print("KERNEL_OK")
</pallas_src>

<mosaic_0001>
module attributes {stable_mosaic.version = 11 : i64} {
  func.func @_gnn_kernel(%arg0: i32, %arg1: i32, %arg2: memref<128x16xf32, #tpu.memory_space<vmem>>, %arg3: memref<16x128xf32, #tpu.memory_space<vmem>>, %arg4: memref<128x128xf32, #tpu.memory_space<vmem>>, %arg5: memref<2x128xf32, #tpu.memory_space<vmem>>, %arg6: memref<8x128xf32, #tpu.memory_space<vmem>>) attributes {dimension_semantics = [#tpu.dimension_semantics<parallel>, #tpu.dimension_semantics<arbitrary>], iteration_bounds = array<i64: 2, 2>, scalar_prefetch = 0 : i64, scratch_operands = 0 : i64, tpu.core_type = #tpu.core_type<tc>, window_params = [{transform_indices = @transform_0, window_bounds = array<i64: 128, 16>}, {pipeline_mode = #tpu.pipeline_mode<synchronous>, transform_indices = @transform_1, window_bounds = array<i64: 16, 128>}, {pipeline_mode = #tpu.pipeline_mode<synchronous>, transform_indices = @transform_2, window_bounds = array<i64: 128, 128>}, {pipeline_mode = #tpu.pipeline_mode<synchronous>, transform_indices = @transform_3, window_bounds = array<i64: 2, 128>}, {transform_indices = @transform_4, window_bounds = array<i64: 8, 128>}]} {
    %c0_i32 = arith.constant 0 : i32
    %0 = arith.cmpi eq, %arg1, %c0_i32 : i32
    %1 = arith.extui %0 : i1 to i32
    %c0_i32_0 = arith.constant 0 : i32
    %2 = arith.cmpi ne, %1, %c0_i32_0 : i32
    scf.if %2 {
      %cst_14 = arith.constant 0.000000e+00 : f32
      %28 = vector.broadcast %cst_14 : f32 to vector<8x128xf32>
      %c0_15 = arith.constant 0 : index
      %c0_16 = arith.constant 0 : index
      %29 = vector.load %arg6[%c0_15, %c0_16] : memref<8x128xf32, #tpu.memory_space<vmem>>, vector<8x128xf32>
      tpu.vector_store %arg6[%c0_15, %c0_16], %28 {strides = array<i32>} : memref<8x128xf32, #tpu.memory_space<vmem>>, vector<8x128xf32>,
    } else {
    }
    %c0 = arith.constant 0 : index
    %c0_1 = arith.constant 0 : index
    %3 = vector.load %arg2[%c0, %c0_1] : memref<128x16xf32, #tpu.memory_space<vmem>>, vector<128x16xf32>
    %c0_2 = arith.constant 0 : index
    %c0_3 = arith.constant 0 : index
    %4 = vector.load %arg3[%c0_2, %c0_3] : memref<16x128xf32, #tpu.memory_space<vmem>>, vector<16x128xf32>
    %cst = arith.constant dense<0.000000e+00> : vector<128x128xf32>
    %5 = tpu.matmul %3, %4, %cst {dimension_numbers = #tpu.dot_dimension_numbers<[1], [0], [0], [1], [0, 0, 1, 1], [], []>} : vector<128x16xf32>, vector<16x128xf32>, vector<128x128xf32> -> vector<128x128xf32>
    %c0_4 = arith.constant 0 : index
    %c0_5 = arith.constant 0 : index
    %6 = vector.load %arg5[%c0_4, %c0_5] : memref<2x128xf32, #tpu.memory_space<vmem>>, vector<1x128xf32>
    %7 = vector.broadcast %6 : vector<1x128xf32> to vector<128x128xf32>
    %8 = arith.addf %5, %7 : vector<128x128xf32>
    %cst_6 = arith.constant 0.000000e+00 : f32
    %9 = vector.broadcast %cst_6 : f32 to vector<128x128xf32>
    %10 = arith.maximumf %8, %9 : vector<128x128xf32>
    %c0_7 = arith.constant 0 : index
    %c0_8 = arith.constant 0 : index
    %11 = vector.load %arg4[%c0_7, %c0_8] : memref<128x128xf32, #tpu.memory_space<vmem>>, vector<128x128xf32>
    %cst_9 = arith.constant dense<0.000000e+00> : vector<128x128xf32>
    %12 = tpu.matmul %10, %11, %cst_9 {dimension_numbers = #tpu.dot_dimension_numbers<[1], [0], [0], [1], [0, 0, 1, 1], [], []>} : vector<128x128xf32>, vector<128x128xf32>, vector<128x128xf32> -> vector<128x128xf32>
    %c1 = arith.constant 1 : index
    %c0_10 = arith.constant 0 : index
    %13 = vector.load %arg5[%c1, %c0_10] : memref<2x128xf32, #tpu.memory_space<vmem>>, vector<1x128xf32>
    %14 = vector.broadcast %13 : vector<1x128xf32> to vector<128x128xf32>
    %15 = arith.addf %12, %14 : vector<128x128xf32>
    %cst_11 = arith.constant 0.000000e+00 : f32
    %16 = vector.broadcast %cst_11 : f32 to vector<128x128xf32>
    %17 = arith.maximumf %15, %16 : vector<128x128xf32>
    %c2_i32 = arith.constant 2 : i32
    %18 = arith.muli %arg0, %c2_i32 : i32
    %19 = arith.addi %18, %arg1 : i32
    %c1_i32 = arith.constant 1 : i32
    %20 = arith.addi %19, %c1_i32 : i32
    %c128_i32 = arith.constant 128 : i32
    %21 = arith.muli %20, %c128_i32 : i32
    %c300_i32 = arith.constant 300 : i32
    %22 = arith.cmpi sgt, %21, %c300_i32 : i32
    %true = arith.constant true
    %23 = arith.xori %22, %true : i1
    %24 = arith.extui %23 : i1 to i32
    %c0_i32_12 = arith.constant 0 : i32
    %25 = arith.cmpi ne, %24, %c0_i32_12 : i32
    scf.if %25 {
      %c0_14 = arith.constant 0 : index
      %c0_15 = arith.constant 0 : index
      %28 = vector.load %arg6[%c0_14, %c0_15] : memref<8x128xf32, #tpu.memory_space<vmem>>, vector<1x128xf32>
      %cst_16 = arith.constant dense<0.000000e+00> : vector<128xf32>
      %29 = vector.multi_reduction <add>, %17, %cst_16 [0] : vector<128x128xf32> to vector<128xf32>
      %30 = vector.shape_cast %29 : vector<128xf32> to vector<1x128xf32>
      %31 = arith.addf %28, %30 : vector<1x128xf32>
      %c0_17 = arith.constant 0 : index
      %c0_18 = arith.constant 0 : index
      %32 = vector.load %arg6[%c0_17, %c0_18] : memref<8x128xf32, #tpu.memory_space<vmem>>, vector<1x128xf32>
      tpu.vector_store %arg6[%c0_17, %c0_18], %31 {strides = array<i32>} : memref<8x128xf32, #tpu.memory_space<vmem>>, vector<1x128xf32>,
    } else {
    }
    %26 = arith.extui %22 : i1 to i32
    %c0_i32_13 = arith.constant 0 : i32
    %27 = arith.cmpi ne, %26, %c0_i32_13 : i32
    scf.if %27 {
      %c128_i32_14 = arith.constant 128 : i32
      %28 = arith.muli %19, %c128_i32_14 : i32
      %29 = tpu.iota {dimensions = array<i32: 0>} : vector<128x1xi32>
      %30 = vector.broadcast %28 : i32 to vector<128x1xi32>
      %31 = arith.addi %30, %29 : vector<128x1xi32>
      %c300_i32_15 = arith.constant 300 : i32
      %32 = vector.broadcast %c300_i32_15 : i32 to vector<128x1xi32>
      %33 = arith.cmpi slt, %31, %32 : vector<128x1xi32>
      %cst_16 = arith.constant 0.000000e+00 : f32
      %34 = vector.shape_cast %33 : vector<128x1xi1> to vector<128x1xi1>
      %35 = vector.broadcast %34 : vector<128x1xi1> to vector<128x128xi1>
      %36 = vector.broadcast %cst_16 : f32 to vector<128x128xf32>
      %37 = arith.select %35, %17, %36 : vector<128x128xi1>, vector<128x128xf32>
      %c0_17 = arith.constant 0 : index
      %c0_18 = arith.constant 0 : index
      %38 = vector.load %arg6[%c0_17, %c0_18] : memref<8x128xf32, #tpu.memory_space<vmem>>, vector<1x128xf32>
      %cst_19 = arith.constant dense<0.000000e+00> : vector<128xf32>
      %39 = vector.multi_reduction <add>, %37, %cst_19 [0] : vector<128x128xf32> to vector<128xf32>
      %40 = vector.shape_cast %39 : vector<128xf32> to vector<1x128xf32>
      %41 = arith.addf %38, %40 : vector<1x128xf32>
      %c0_20 = arith.constant 0 : index
      %c0_21 = arith.constant 0 : index
      %42 = vector.load %arg6[%c0_20, %c0_21] : memref<8x128xf32, #tpu.memory_space<vmem>>, vector<1x128xf32>
      tpu.vector_store %arg6[%c0_20, %c0_21], %41 {strides = array<i32>} : memref<8x128xf32, #tpu.memory_space<vmem>>, vector<1x128xf32>,
    } else {
    }
    return
  }
  func.func @transform_0(%arg0: i32, %arg1: i32) -> (i32, i32) {
    %c2_i32 = arith.constant 2 : i32
    %0 = arith.muli %arg0, %c2_i32 : i32
    %1 = arith.addi %0, %arg1 : i32
    %c2_i32_0 = arith.constant 2 : i32
    %2 = arith.minsi %1, %c2_i32_0 : i32
    %c0_i32 = arith.constant 0 : i32
    %c0_i32_1 = arith.constant 0 : i32
    return %2, %c0_i32 : i32, i32
  }
  func.func @transform_1(%arg0: i32, %arg1: i32) -> (i32, i32) {
    %c0_i32 = arith.constant 0 : i32
    %c0_i32_0 = arith.constant 0 : i32
    %c0_i32_1 = arith.constant 0 : i32
    return %c0_i32, %c0_i32_0 : i32, i32
  }
  func.func @transform_2(%arg0: i32, %arg1: i32) -> (i32, i32) {
    %c0_i32 = arith.constant 0 : i32
    %c0_i32_0 = arith.constant 0 : i32
    %c0_i32_1 = arith.constant 0 : i32
    return %c0_i32, %c0_i32_0 : i32, i32
  }
  func.func @transform_3(%arg0: i32, %arg1: i32) -> (i32, i32) {
    %c0_i32 = arith.constant 0 : i32
    %c0_i32_0 = arith.constant 0 : i32
    %c0_i32_1 = arith.constant 0 : i32
    return %c0_i32, %c0_i32_0 : i32, i32
  }
  func.func @transform_4(%arg0: i32, %arg1: i32) -> (i32, i32) {
    %c0_i32 = arith.constant 0 : i32
    %c0_i32_0 = arith.constant 0 : i32
    return %arg0, %c0_i32 : i32, i32
  }
}

</mosaic_0001>

<bundles_post_ra>
// kernel: tpu_custom_call.1
= control target key start
LH: loop header
LB: loop body
LE: loop exit
PB: predicated region body
PF: predicated region fallthrough
CT: control target
= control target key end

     0   :  { %9 = vsyncpa [#allocation3], 0  ;;  %s1690_s0 = inlined_call_operand.vmem [shape: f32[300,16], index: 0, kind: input, shape index: {}]   ;;  %s1691_s1 = inlined_call_operand.vmem [shape: f32[16,128], index: 1, kind: input, shape index: {}]   ;;  %s1692_s2 = inlined_call_operand.vmem [shape: f32[128,128], index: 2, kind: input, shape index: {}]   ;;  %s1693_s3 = inlined_call_operand.vmem [shape: f32[2,128], index: 3, kind: input, shape index: {}]   ;;  %s1694_s4 = inlined_call_operand.hbm [shape: f32[16,128], index: 4, kind: output, shape index: {}]  }
   0x1   :  { %11 = vsyncpa [#allocation3 + $0x1], 0  ;;  %s1321_s15 = smov 0   ;;  %s1323_s16 = smov 0  }
   0x2   :  { %s1325_s17 = smov 0   ;;  %s1327_s18 = smov 0  }
   0x3   :  { %s1329_s19 = smov 0   ;;  %s1331_s20 = smov 0  }
   0x4   :  { %s1333_s21 = smov 0   ;;  %s1335_s22 = smov 0  }
   0x5 LB: > { %s921_s23 = sadd.s32 4294967295, %s1292_s22   ;;  %s922_s24 = sadd.s32 4294967294, %s1292_s22   ;;  %s1292_s22 = sphi %s1335_s22, %s17_s22   ;;  %s1288_s21 = sphi %s1333_s21, %s1703_s21   ;;  %s1284_s20 = sphi %s1331_s20, %s1702_s20   ;;  %s1280_s19 = sphi %s1329_s19, %s1701_s19   ;;  %s1276_s18 = sphi %s1327_s18, %s1700_s18   ;;  %s1272_s17 = sphi %s1325_s17, %s1699_s17   ;;  %s1268_s16 = sphi %s1323_s16, %s1698_s16   ;;  %s1264_s15 = sphi %s1321_s15, %s1697_s15  }
   0x6   : > { %s26_s25 = sadd.s32 1, %s1284_s20  ;;  %s29_s26 = sadd.s32 1, %s1288_s21 }
   0x7   : > { %p27_p0 = scmp.ge.s32.totalorder %s26_s25, 2  ;;  %p143_p1 = scmp.ne.s32.totalorder %s1272_s17, %s1268_s16 }
   0x8   : > { %p144_p2 = scmp.eq.s32.totalorder %s921_s23, 3  ;;  %p149_p4 = scmp.ne.s32.totalorder %s1268_s16, %s1264_s15 }
   0x9   : > { %s1705_s25 = smov (%p27_p0, %s26_s25), 0  ;;  %s1707_s26 = smov (!%p27_p0, %s29_s26), %s1288_s21 }
   0xa   : > { %p1370_p3 = por %p144_p2, %p143_p1  ;;  %p31_p5 = scmp.ge.s32.totalorder %s1707_s26, 2 }
   0xb   : > { %p150_p6 = scmp.eq.s32.totalorder %s922_s24, 3  ;;  %p927_p7 = scmp.ge.s32.totalorder %s1292_s22, 1 }
   0xc   : > { %p202_p8 = scmp.lt.s32.totalorder %s1292_s22, 5  ;;  %s1709_s26 = smov (%p31_p5, %s1707_s26), 0 }
   0xd   : > { %p1380_p9 = por %p150_p6, %p149_p4  ;;  %s130_s29 = ssub.s32 %s1288_s21, %s1709_s26 }
   0xe   : > { %p203_p10 = pnand %p927_p7, %p202_p8  ;;  %s133_s30 = sadd.s32 1, %s1272_s17 }
   0xf   : > { %p131_p11 = scmp.eq.s32.totalorder %s130_s29, 0  ;;  %s233_s6 = sand.u32 (!%p203_p10), 1, %s1268_s16  }
  0x10   : > { %206 = sbr.rel (%p203_p10) target bundleno = 592 (0x250), region = 36  ;;  %s929_s7 = sshll.u32 (!%p203_p10), %s1280_s19, 1 }
  0x11   : > { %s1388_s5 = scalar_select %p131_p11, %s1272_s17, %s133_s30  }
  0x12   : > { %s928_s8 = sshll.u32 (!%p203_p10), %s233_s6, 3  ;;  %s1395_s9 = sadd.s32 (!%p203_p10), %s1276_s18, %s929_s7 }
  0x13   : > { %p238_p12 = scmp.lt.s32.totalorder (!%p203_p10), %s1395_s9, 2  ;;  %s1404_s24 = scalar_lea.vmem (!%p203_p10), [#allocation2], %s928_s8 }
  0x14   : > { %p932_p0 = scmp.ne.s32.totalorder (!%p203_p10), %s1276_s18, 0 }
  0x15   : > { %s239_s10 = scalar_select %p238_p12, %s1395_s9, 2 }
  0x17   : > { %s930_s11 = sshll.u32 %s239_s10, 4 }
  0x18   : > { %p245_p13 = scmp.lt.s32.totalorder %s930_s11, 37  ;;  %261 = sbr.rel (%p932_p0) target bundleno = 31 (0x1f), region = 40 }
  0x1a   : > { %s1711_s11 = smov (!%p245_p13, %s930_s11), 37 }
  0x1b   : > { %s931_s12 = sshll.u32 %s1711_s11, 3 }
  0x1c   : > { %s1402_s23 = scalar_lea.vmem %s1690_s0, %s931_s12 }
  0x1d   : > { %v1294_v0 = vmov 0.0  }
  0x1e   : > { %262 = vst [vmem:[%s1404_s24] sm:$0xff] %v1294_v0 }
  0x1f PF: > { %v280_v1 = vld [vmem:[%s1691_s1 + $0x8] sm:$0xff]  ;;  %v279_v2 = vld [vmem:[%s1691_s1] sm:$0xff]  ;;  %vm286_vm0 = vcmask 130048   ;;  %v265_v5 = vld [vmem:[%s1402_s23 + $0x10] sm:$0xff]  ;;  %s960_s12 = sshll.u32 %s1395_s9, 7 }
  0x20   : > { %v263_v3 = vld [vmem:[%s1402_s23] sm:$0xff]  ;;  %1012 = vmatprep.subr.mxu0 %v280_v1  ;;  %v264_v4 = vld [vmem:[%s1402_s23 + $0x8] sm:$0xff]  ;;  %v266_v6 = vld [vmem:[%s1402_s23 + $0x18] sm:$0xff]  ;;  %s1500_s13 = sadd.s32 128, %s960_s12 }
  0x21   : > { %1016 = vmatprep.mubr.msk.f32.mxu0 %vm286_vm0, %v263_v3  ;;  %1013 = vmatpush3.msra.mxu0 %v280_v1  ;;  %v511_v7 = vld [vmem:[%s1692_s2 + $0x78] sm:$0xff]  ;;  %v510_v8 = vld [vmem:[%s1692_s2 + $0x70] sm:$0xff]  ;;  %v267_v9 = vld [vmem:[%s1402_s23 + $0x20] sm:$0xff]  ;;  %p953_p1 = scmp.gt.s32.totalorder %s1500_s13, 300 }
  0x22   : > { %1014 = vmatprep.subr.mxu0 %v279_v2  ;;  %1096 = vmatprep.subr.mxu1 %v511_v7  ;;  %v509_v10 = vld [vmem:[%s1692_s2 + $0x68] sm:$0xff]  ;;  %v508_v12 = vld [vmem:[%s1692_s2 + $0x60] sm:$0xff]  ;;  %v269_v13 = vld [vmem:[%s1402_s23 + $0x30] sm:$0xff] }
  0x23   : > { %1015 = vmatpush3.msra.mxu0 %v279_v2  ;;  %1112 = vmatpush3.msra.mxu1 %v511_v7  ;;  %v268_v11 = vld [vmem:[%s1402_s23 + $0x28] sm:$0xff]  ;;  %v507_v14 = vld [vmem:[%s1692_s2 + $0x58] sm:$0xff]  ;;  %v506_v16 = vld [vmem:[%s1692_s2 + $0x50] sm:$0xff] }
  0x24   : > { %1017 = vmatmul.mubr.msk.f32.vlgmr.msra.gmra.mxu0 %vm286_vm0, %v264_v4  ;;  %1040 = vmatprep.subr.mxu0 %v511_v7  ;;  %v270_v15 = vld [vmem:[%s1402_s23 + $0x38] sm:$0xff]  ;;  %v271_v17 = vld [vmem:[%s1402_s23 + $0x40] sm:$0xff]  ;;  %v505_v18 = vld [vmem:[%s1692_s2 + $0x48] sm:$0xff] }
  0x25   : > { %1019 = vmatprep.mubr.msk.f32.mxu0 %vm286_vm0, %v265_v5  ;;  %1041 = vmatpush3.msra.mxu0 %v511_v7  ;;  %v272_v19 = vld [vmem:[%s1402_s23 + $0x48] sm:$0xff]  ;;  %v504_v20 = vld [vmem:[%s1692_s2 + $0x40] sm:$0xff]  ;;  %v273_v21 = vld [vmem:[%s1402_s23 + $0x50] sm:$0xff] }
  0x26   : > { %1042 = vmatprep.subr.mxu0 %v510_v8  ;;  %1097 = vmatprep.subr.mxu1 %v510_v8  ;;  %v503_v22 = vld [vmem:[%s1692_s2 + $0x38] sm:$0xff]  ;;  %v502_v24 = vld [vmem:[%s1692_s2 + $0x30] sm:$0xff]  ;;  %v275_v25 = vld [vmem:[%s1402_s23 + $0x60] sm:$0xff] }
  0x27   : > { %1043 = vmatpush3.msra.mxu0 %v510_v8  ;;  %1113 = vmatpush3.msra.mxu1 %v510_v8  ;;  %v274_v23 = vld [vmem:[%s1402_s23 + $0x58] sm:$0xff]  ;;  %v501_v26 = vld [vmem:[%s1692_s2 + $0x28] sm:$0xff]  ;;  %v500_v28 = vld [vmem:[%s1692_s2 + $0x20] sm:$0xff] }
  0x28   : > { %1020 = vmatmul.mubr.msk.f32.gmra.mxu0 %vm286_vm0, %v266_v6  ;;  %1044 = vmatprep.subr.mxu0 %v509_v10  ;;  %v276_v27 = vld [vmem:[%s1402_s23 + $0x68] sm:$0xff]  ;;  %v277_v29 = vld [vmem:[%s1402_s23 + $0x70] sm:$0xff]  ;;  %v278_v30 = vld [vmem:[%s1402_s23 + $0x78] sm:$0xff] }
  0x29   : > { %1022 = vmatprep.mubr.msk.f32.mxu0 %vm286_vm0, %v267_v9  ;;  %1045 = vmatpush3.msra.mxu0 %v509_v10  ;;  %v499_v31 = vld [vmem:[%s1692_s2 + $0x18] sm:$0xff]  ;;  %v498_v32 = vld [vmem:[%s1692_s2 + $0x10] sm:$0xff]  ;;  %v497_v33 = vld [vmem:[%s1692_s2 + $0x8] sm:$0xff] }
  0x2a   : > { %1046 = vmatprep.subr.mxu0 %v508_v12  ;;  %1098 = vmatprep.subr.mxu1 %v509_v10  ;;  %v496_v34 = vld [vmem:[%s1692_s2] sm:$0xff] }
  0x2b   : > { %1047 = vmatpush3.msra.mxu0 %v508_v12  ;;  %1114 = vmatpush3.msra.mxu1 %v509_v10  ;;  %v933_v35 = vld [vmem:[%s1693_s3] ss:$0 sm:$0xff] }
  0x2c   : > { %1023 = vmatmul.mubr.msk.f32.gmra.mxu0 %vm286_vm0, %v268_v11  ;;  %1048 = vmatprep.subr.mxu0 %v507_v14 }
  0x2d   : > { %1025 = vmatprep.mubr.msk.f32.mxu0 %vm286_vm0, %v269_v13  ;;  %1049 = vmatpush3.msra.mxu0 %v507_v14 }
  0x2e   : > { %1050 = vmatprep.subr.mxu0 %v506_v16  ;;  %1099 = vmatprep.subr.mxu1 %v508_v12 }
  0x2f   : > { %1051 = vmatpush3.msra.mxu0 %v506_v16  ;;  %1115 = vmatpush3.msra.mxu1 %v508_v12 }
  0x30   : > { %1026 = vmatmul.mubr.msk.f32.gmra.mxu0 %vm286_vm0, %v270_v15  ;;  %1052 = vmatprep.subr.mxu0 %v505_v18 }
  0x31   : > { %1028 = vmatprep.mubr.msk.f32.mxu0 %vm286_vm0, %v271_v17  ;;  %1053 = vmatpush3.msra.mxu0 %v505_v18 }
  0x32   : > { %1054 = vmatprep.subr.mxu0 %v504_v20  ;;  %1100 = vmatprep.subr.mxu1 %v507_v14 }
  0x33   : > { %1055 = vmatpush3.msra.mxu0 %v504_v20  ;;  %1116 = vmatpush3.msra.mxu1 %v507_v14 }
  0x34   : > { %1029 = vmatmul.mubr.msk.f32.gmra.mxu0 %vm286_vm0, %v272_v19  ;;  %1056 = vmatprep.subr.mxu0 %v503_v22 }
  0x35   : > { %1031 = vmatprep.mubr.msk.f32.mxu0 %vm286_vm0, %v273_v21  ;;  %1057 = vmatpush3.msra.mxu0 %v503_v22 }
  0x36   : > { %1058 = vmatprep.subr.mxu0 %v502_v24  ;;  %1101 = vmatprep.subr.mxu1 %v506_v16 }
  0x37   : > { %1059 = vmatpush3.msra.mxu0 %v502_v24  ;;  %1117 = vmatpush3.msra.mxu1 %v506_v16 }
  0x38   : > { %1032 = vmatmul.mubr.msk.f32.gmra.mxu0 %vm286_vm0, %v274_v23  ;;  %1060 = vmatprep.subr.mxu0 %v501_v26 }
  0x39   : > { %1034 = vmatprep.mubr.msk.f32.mxu0 %vm286_vm0, %v275_v25  ;;  %1061 = vmatpush3.msra.mxu0 %v501_v26 }
  0x3a   : > { %1062 = vmatprep.subr.mxu0 %v500_v28  ;;  %1102 = vmatprep.subr.mxu1 %v505_v18 }
  0x3b   : > { %1063 = vmatpush3.msra.mxu0 %v500_v28  ;;  %1118 = vmatpush3.msra.mxu1 %v505_v18 }
  0x3c   : > { %1035 = vmatmul.mubr.msk.f32.gmra.mxu0 %vm286_vm0, %v276_v27  ;;  %1103 = vmatprep.subr.mxu1 %v504_v20 }
  0x3d   : > { %1037 = vmatprep.mubr.msk.f32.mxu0 %vm286_vm0, %v277_v29  ;;  %1119 = vmatpush3.msra.mxu1 %v504_v20  ;;  %v950_v20 = vld [vmem:[%s1693_s3 + $0x1] ss:$0 sm:$0xff] }
  0x3e   : > { %1104 = vmatprep.subr.mxu1 %v503_v22  ;;  %1064 = vmatprep.subr.mxu0 %v499_v31 }
  0x3f   : > { %1120 = vmatpush3.msra.mxu1 %v503_v22  ;;  %1065 = vmatpush3.msra.mxu0 %v499_v31 }
  0x40   : > { %1038 = vmatmul.mubr.msk.f32.gmra.mxu0 %vm286_vm0, %v278_v30  ;;  %1105 = vmatprep.subr.mxu1 %v502_v24 }
  0x41   : > { %1121 = vmatpush3.msra.mxu1 %v502_v24  ;;  %1066 = vmatprep.subr.mxu0 %v498_v32 }
  0x42   : > { %1106 = vmatprep.subr.mxu1 %v501_v26  ;;  %1067 = vmatpush3.msra.mxu0 %v498_v32 }
  0x43   : > { %1122 = vmatpush3.msra.mxu1 %v501_v26  ;;  %1068 = vmatprep.subr.mxu0 %v497_v33 }
  0x44   : > { %1107 = vmatprep.subr.mxu1 %v500_v28  ;;  %1069 = vmatpush3.msra.mxu0 %v497_v33 }
  0x45   : > { %1123 = vmatpush3.msra.mxu1 %v500_v28  ;;  %1070 = vmatprep.subr.mxu0 %v496_v34 }
  0x46   : > { %1108 = vmatprep.subr.mxu1 %v499_v31  ;;  %1071 = vmatpush3.msra.mxu0 %v496_v34 }
  0x47   : > { %1124 = vmatpush3.msra.mxu1 %v499_v31 }
  0x48   : > { %1109 = vmatprep.subr.mxu1 %v498_v32 }
  0x49   : > { %1125 = vmatpush3.msra.mxu1 %v498_v32 }
  0x4a   : > { %1110 = vmatprep.subr.mxu1 %v497_v33 }
  0x4b   : > { %1126 = vmatpush3.msra.mxu1 %v497_v33 }
  0x4c   : > { %1111 = vmatprep.subr.mxu1 %v496_v34 }
  0x4d   : > { %1127 = vmatpush3.msra.mxu1 %v496_v34 }
  0xe4   : > { %v1018_v36 = vpop.f32.mrf.mxu0 }
  0xe5   : > { %v407_v37 = vadd.f32 %v1018_v36, %v933_v35 }
  0xe6   : > { %v401_v38 = vpop.f32.mrf.mxu0 }
  0xe7   : > { %v402_v39 = vadd.f32 %v933_v35, %v401_v38  ;;  %v481_v42 = vmax.f32 %v407_v37, 0.0 }
  0xe8   : > { %v1021_v40 = vpop.f32.mrf.mxu0 }
  0xe9   : > { %v480_v41 = vmax.f32 %v402_v39, 0.0  ;;  %v417_v43 = vadd.f32 %v1021_v40, %v933_v35 }
  0xea   : > { %v411_v44 = vpop.f32.mrf.mxu0 }
  0xeb   : > { %v412_v45 = vadd.f32 %v933_v35, %v411_v44  ;;  %1072 = vmatprep.mubr.f32.mxu0 %v480_v41  ;;  %v483_v48 = vmax.f32 %v417_v43, 0.0 }
  0xec   : > { %v1024_v46 = vpop.f32.mrf.mxu0  ;;  %1073 = vmatmul.mubr.f32.vlgmr.msra.gmra.mxu0 %v481_v42 }
  0xed   : > { %v482_v47 = vmax.f32 %v412_v45, 0.0  ;;  %v427_v49 = vadd.f32 %v1024_v46, %v933_v35 }
  0xee   : > { %v421_v50 = vpop.f32.mrf.mxu0 }
  0xef   : > { %v422_v51 = vadd.f32 %v933_v35, %v421_v50  ;;  %1075 = vmatprep.mubr.f32.mxu0 %v482_v47  ;;  %v485_v54 = vmax.f32 %v427_v49, 0.0 }
  0xf0   : > { %v1027_v52 = vpop.f32.mrf.mxu0  ;;  %1076 = vmatmul.mubr.f32.gmra.mxu0 %v483_v48 }
  0xf1   : > { %v484_v53 = vmax.f32 %v422_v51, 0.0  ;;  %v437_v55 = vadd.f32 %v1027_v52, %v933_v35 }
  0xf2   : > { %v431_v56 = vpop.f32.mrf.mxu0 }
  0xf3   : > { %1078 = vmatprep.mubr.f32.mxu0 %v484_v53  ;;  %v432_v57 = vadd.f32 %v933_v35, %v431_v56  ;;  %v487_v60 = vmax.f32 %v437_v55, 0.0 }
  0xf4   : > { %v1030_v58 = vpop.f32.mrf.mxu0  ;;  %1079 = vmatmul.mubr.f32.gmra.mxu0 %v485_v54 }
  0xf5   : > { %v486_v59 = vmax.f32 %v432_v57, 0.0  ;;  %v447_v61 = vadd.f32 %v1030_v58, %v933_v35 }
  0xf6   : > { %v441_v62 = vpop.f32.mrf.mxu0 }
  0xf7   : > { %v442_v63 = vadd.f32 %v933_v35, %v441_v62  ;;  %1081 = vmatprep.mubr.f32.mxu1 %v486_v59  ;;  %v489_v2 = vmax.f32 %v447_v61, 0.0 }
  0xf8   : > { %v1033_v0 = vpop.f32.mrf.mxu0  ;;  %1082 = vmatmul.mubr.f32.vlgmr.msra.gmra.mxu1 %v487_v60 }
  0xf9   : > { %v488_v1 = vmax.f32 %v442_v63, 0.0  ;;  %v457_v3 = vadd.f32 %v1033_v0, %v933_v35 }
  0xfa   : > { %v451_v4 = vpop.f32.mrf.mxu0 }
  0xfb   : > { %v452_v5 = vadd.f32 %v933_v35, %v451_v4  ;;  %1084 = vmatprep.mubr.f32.mxu1 %v488_v1  ;;  %v491_v8 = vmax.f32 %v457_v3, 0.0 }
  0xfc   : > { %v1036_v6 = vpop.f32.mrf.mxu0  ;;  %1085 = vmatmul.mubr.f32.gmra.mxu1 %v489_v2 }
  0xfd   : > { %v490_v7 = vmax.f32 %v452_v5, 0.0  ;;  %v467_v9 = vadd.f32 %v1036_v6, %v933_v35 }
  0xfe   : > { %v461_v10 = vpop.f32.mrf.mxu0 }
  0xff   : > { %v462_v11 = vadd.f32 %v933_v35, %v461_v10  ;;  %1087 = vmatprep.mubr.f32.mxu1 %v490_v7  ;;  %v493_v14 = vmax.f32 %v467_v9, 0.0 }
 0x100   : > { %v1039_v12 = vpop.f32.mrf.mxu0  ;;  %1088 = vmatmul.mubr.f32.gmra.mxu1 %v491_v8 }
 0x101   : > { %v492_v13 = vmax.f32 %v462_v11, 0.0  ;;  %v477_v15 = vadd.f32 %v1039_v12, %v933_v35 }
 0x102   : > { %v471_v16 = vpop.f32.mrf.mxu0 }
 0x103   : > { %v472_v17 = vadd.f32 %v933_v35, %v471_v16  ;;  %1090 = vmatprep.mubr.f32.mxu1 %v492_v13  ;;  %v495_v19 = vmax.f32 %v477_v15, 0.0 }
 0x104   : > { %1091 = vmatmul.mubr.f32.gmra.mxu1 %v493_v14 }
 0x105   : > { %v494_v18 = vmax.f32 %v472_v17, 0.0 }
 0x107   : > { %1093 = vmatprep.mubr.f32.mxu1 %v494_v18 }
 0x108   : > { %1094 = vmatmul.mubr.f32.gmra.mxu1 %v495_v19 }
 0x1ac   : > { %v1074_v21 = vpop.f32.mrf.mxu0 }
 0x1ad   : > { %v1505_v22 = vadd.f32 %v1074_v21, %v950_v20 }
 0x1ae   : > { %v583_v23 = vpop.f32.mrf.mxu0 }
 0x1af   : > { %v663_v24 = vmax.f32 %v1505_v22, 0.0  ;;  %v1508_v25 = vadd.f32 %v950_v20, %v583_v23 }
 0x1b0   : > { %v1077_v26 = vpop.f32.mrf.mxu0 }
 0x1b1   : > { %v662_v27 = vmax.f32 %v1508_v25, 0.0  ;;  %v1511_v28 = vadd.f32 %v1077_v26, %v950_v20 }
 0x1b2   : > { %v593_v29 = vpop.f32.mrf.mxu0 }
 0x1b3   : > { %v665_v30 = vmax.f32 %v1511_v28, 0.0  ;;  %v1514_v31 = vadd.f32 %v950_v20, %v593_v29 }
 0x1b4   : > { %v1080_v32 = vpop.f32.mrf.mxu0 }
 0x1b5   : > { %v664_v33 = vmax.f32 %v1514_v31, 0.0  ;;  %v1517_v34 = vadd.f32 %v1080_v32, %v950_v20 }
 0x1b6   : > { %v603_v35 = vpop.f32.mrf.mxu0 }
 0x1b7   : > { %v667_v36 = vmax.f32 %v1517_v34, 0.0  ;;  %v1520_v37 = vadd.f32 %v950_v20, %v603_v35 }
 0x1b8   : > { %v1083_v38 = vpop.f32.mrf.mxu1 }
 0x1b9   : > { %v666_v39 = vmax.f32 %v1520_v37, 0.0  ;;  %v1523_v40 = vadd.f32 %v1083_v38, %v950_v20 }
 0x1ba   : > { %v613_v41 = vpop.f32.mrf.mxu1 }
 0x1bb   : > { %v669_v42 = vmax.f32 %v1523_v40, 0.0  ;;  %v1526_v43 = vadd.f32 %v950_v20, %v613_v41 }
 0x1bc   : > { %v1086_v44 = vpop.f32.mrf.mxu1 }
 0x1bd   : > { %v668_v45 = vmax.f32 %v1526_v43, 0.0  ;;  %v1529_v46 = vadd.f32 %v1086_v44, %v950_v20 }
 0x1be   : > { %v623_v47 = vpop.f32.mrf.mxu1 }
 0x1bf   : > { %v671_v48 = vmax.f32 %v1529_v46, 0.0  ;;  %v1532_v49 = vadd.f32 %v950_v20, %v623_v47 }
 0x1c0   : > { %v1089_v50 = vpop.f32.mrf.mxu1 }
 0x1c1   : > { %v670_v51 = vmax.f32 %v1532_v49, 0.0  ;;  %v1535_v52 = vadd.f32 %v1089_v50, %v950_v20 }
 0x1c2   : > { %v633_v53 = vpop.f32.mrf.mxu1 }
 0x1c3   : > { %v673_v54 = vmax.f32 %v1535_v52, 0.0  ;;  %v1538_v55 = vadd.f32 %v950_v20, %v633_v53 }
 0x1c4   : > { %v1092_v56 = vpop.f32.mrf.mxu1 }
 0x1c5   : > { %v672_v57 = vmax.f32 %v1538_v55, 0.0  ;;  %v1541_v58 = vadd.f32 %v1092_v56, %v950_v20 }
 0x1c6   : > { %v643_v59 = vpop.f32.mrf.mxu1 }
 0x1c7   : > { %v675_v60 = vmax.f32 %v1541_v58, 0.0  ;;  %v1544_v61 = vadd.f32 %v950_v20, %v643_v59 }
 0x1c8   : > { %v1095_v62 = vpop.f32.mrf.mxu1 }
 0x1c9   : > { %v674_v63 = vmax.f32 %v1544_v61, 0.0  ;;  %v1547_v0 = vadd.f32 %v1095_v62, %v950_v20  ;;  %686 = sbr.rel (%p953_p1) target bundleno = 507 (0x1fb), region = 44 }
 0x1ca   : > { %v653_v1 = vpop.f32.mrf.mxu1 }
 0x1cb   : > { %v677_v2 = vmax.f32 %v1547_v0, 0.0  ;;  %v1550_v3 = vadd.f32 %v950_v20, %v653_v1 }
 0x1cd   : > { %v676_v4 = vmax.f32 %v1550_v3, 0.0 }
 0x1ce   : > { %v688_v5 = vadd.f32 %v663_v24, %v662_v27  ;;  %v687_v32 = vld [vmem:[%s1404_s24] sm:$0x1] }
 0x1d0   : > { %v689_v6 = vadd.f32 %v688_v5, %v664_v33 }
 0x1d2   : > { %v690_v7 = vadd.f32 %v689_v6, %v665_v30 }
 0x1d4   : > { %v691_v8 = vadd.f32 %v690_v7, %v666_v39 }
 0x1d6   : > { %v692_v9 = vadd.f32 %v691_v8, %v667_v36 }
 0x1d8   : > { %v693_v10 = vadd.f32 %v692_v9, %v668_v45 }
 0x1da   : > { %v694_v11 = vadd.f32 %v693_v10, %v669_v42 }
 0x1dc   : > { %v695_v12 = vadd.f32 %v694_v11, %v670_v51 }
 0x1de   : > { %v696_v13 = vadd.f32 %v695_v12, %v671_v48 }
 0x1e0   : > { %v697_v14 = vadd.f32 %v696_v13, %v672_v57 }
 0x1e2   : > { %v698_v15 = vadd.f32 %v697_v14, %v673_v54 }
 0x1e4   : > { %v699_v16 = vadd.f32 %v698_v15, %v674_v63 }
 0x1e6   : > { %v700_v17 = vadd.f32 %v699_v16, %v675_v60 }
 0x1e8   : > { %v701_v18 = vadd.f32 %v700_v17, %v676_v4 }
 0x1ea   : > { %v702_v19 = vadd.f32 %v701_v18, %v677_v2 }
 0x1ec   : > { %v703_v20 = vrot.slane %v702_v19, 4 }
 0x1ee   : > { %v704_v21 = vadd.f32 %v703_v20, %v702_v19 }
 0x1f0   : > { %v705_v23 = vrot.slane %v704_v21, 2 }
 0x1f2   : > { %v706_v26 = vadd.f32 %v705_v23, %v704_v21 }
 0x1f4   : > { %v707_v29 = vrot.slane %v706_v26, 1 }
 0x1f6   : > { %v708_v35 = vadd.f32 %v707_v29, %v706_v26 }
 0x1f8   : > { %v709_v38 = vadd.f32 %v708_v35, %v687_v32 }
 0x1fa   : > { %710 = vst [vmem:[%s1404_s24] sm:$0x1] %v709_v38 }
 0x1fb PF: > { %p954_p2 = scmp.le.s32.totalorder %s1500_s13, 300 }
 0x1fd   : > { %713 = sbr.rel (%p954_p2) target bundleno = 569 (0x239), region = 48 }
 0x202   : > { %v715_v41 = vlaneseq  ;;  %v1591_v50 = vstv %s960_s12 }
 0x204   : > { %v716_v44 = vshrl.u32 %v715_v41, 7 }
 0x206   : > { %v717_v47 = vadd.s32 8, %v716_v44  ;;  %v718_v53 = vadd.s32 16, %v716_v44  ;;  %v719_v56 = vadd.s32 24, %v716_v44  ;;  %v733_v59 = vadd.s32 %v1591_v50, %v716_v44 }
 0x207   : > { %v720_v1 = vadd.s32 32, %v716_v44  ;;  %v721_v6 = vadd.s32 40, %v716_v44  ;;  %v722_v8 = vadd.s32 48, %v716_v44  ;;  %v723_v12 = vadd.s32 56, %v716_v44 }
 0x208   : > { %v734_v62 = vadd.s32 %v1591_v50, %v717_v47  ;;  %v735_v5 = vadd.s32 %v1591_v50, %v718_v53  ;;  %v736_v7 = vadd.s32 %v1591_v50, %v719_v56  ;;  %vm749_vm1 = vcmp.lt.s32.totalorder %v733_v59, 300 }
 0x209   : > { %v737_v9 = vadd.s32 %v1591_v50, %v720_v1  ;;  %v797_v10 = vsel %vm749_vm1, %v662_v27, 0.0  ;;  %v738_v13 = vadd.s32 %v1591_v50, %v721_v6  ;;  %v724_v15 = vadd.s32 64, %v716_v44 }
 0x20a   : > { %vm750_vm2 = vcmp.lt.s32.totalorder %v734_v62, 300  ;;  %vm751_vm3 = vcmp.lt.s32.totalorder %v735_v5, 300  ;;  %vm752_vm4 = vcmp.lt.s32.totalorder %v736_v7, 300  ;;  %v739_v16 = vadd.s32 %v1591_v50, %v722_v8  ;;  %v813_v8 = vld [vmem:[%s1404_s24] sm:$0x1] }
 0x20b   : > { %v798_v11 = vsel %vm750_vm2, %v663_v24, 0.0  ;;  %v799_v14 = vsel %vm751_vm3, %v664_v33, 0.0  ;;  %vm753_vm5 = vcmp.lt.s32.totalorder %v737_v9, 300  ;;  %v800_v18 = vsel %vm752_vm4, %v665_v30, 0.0 }
 0x20c   : > { %v814_v17 = vadd.f32 %v798_v11, %v797_v10  ;;  %v725_v25 = vadd.s32 72, %v716_v44  ;;  %v740_v27 = vadd.s32 %v1591_v50, %v723_v12  ;;  %vm754_vm6 = vcmp.lt.s32.totalorder %v738_v13, 300 }
 0x20d   : > { %v801_v24 = vsel %vm753_vm5, %v666_v39, 0.0  ;;  %v726_v19 = vadd.s32 80, %v716_v44  ;;  %v741_v31 = vadd.s32 %v1591_v50, %v724_v15  ;;  %vm755_vm7 = vcmp.lt.s32.totalorder %v739_v16, 300 }
 0x20e   : > { %v815_v22 = vadd.f32 %v814_v17, %v799_v14  ;;  %v802_v20 = vsel %vm754_vm6, %v667_v36, 0.0  ;;  %v727_v21 = vadd.s32 88, %v716_v44  ;;  %v742_v28 = vadd.s32 %v1591_v50, %v725_v25 }
 0x20f   : > { %vm756_vm8 = vcmp.lt.s32.totalorder %v740_v27, 300  ;;  %v803_v23 = vsel %vm755_vm7, %v668_v45, 0.0  ;;  %v728_v26 = vadd.s32 96, %v716_v44  ;;  %v743_v37 = vadd.s32 %v1591_v50, %v726_v19 }
 0x210   : > { %v816_v33 = vadd.f32 %v815_v22, %v800_v18  ;;  %vm757_vm9 = vcmp.lt.s32.totalorder %v741_v31, 300  ;;  %v804_v29 = vsel %vm756_vm8, %v669_v42, 0.0  ;;  %v729_v32 = vadd.s32 104, %v716_v44 }
 0x211   : > { %v744_v34 = vadd.s32 %v1591_v50, %v727_v21  ;;  %vm758_vm10 = vcmp.lt.s32.totalorder %v742_v28, 300  ;;  %v805_v35 = vsel %vm757_vm9, %v670_v51, 0.0  ;;  %v730_v38 = vadd.s32 112, %v716_v44 }
 0x212   : > { %v817_v30 = vadd.f32 %v816_v33, %v801_v24  ;;  %v745_v43 = vadd.s32 %v1591_v50, %v728_v26  ;;  %vm759_vm11 = vcmp.lt.s32.totalorder %v743_v37, 300  ;;  %v806_v41 = vsel %vm758_vm10, %v671_v48, 0.0 }
 0x213   : > { %v731_v47 = vadd.s32 120, %v716_v44  ;;  %v746_v40 = vadd.s32 %v1591_v50, %v729_v32  ;;  %vm760_vm12 = vcmp.lt.s32.totalorder %v744_v34, 300  ;;  %v807_v53 = vsel %vm759_vm11, %v672_v57, 0.0 }
 0x214   : > { %v818_v39 = vadd.f32 %v817_v30, %v802_v20  ;;  %v747_v56 = vadd.s32 %v1591_v50, %v730_v38  ;;  %vm761_vm13 = vcmp.lt.s32.totalorder %v745_v43, 300  ;;  %v808_v51 = vsel %vm760_vm12, %v673_v54, 0.0 }
 0x215   : > { %v748_v59 = vadd.s32 %v1591_v50, %v731_v47  ;;  %vm762_vm14 = vcmp.lt.s32.totalorder %v746_v40, 300  ;;  %v809_v48 = vsel %vm761_vm13, %v674_v63, 0.0 }
 0x216   : > { %v819_v36 = vadd.f32 %v818_v39, %v803_v23  ;;  %vm763_vm15 = vcmp.lt.s32.totalorder %v747_v56, 300  ;;  %v810_v55 = vsel %vm762_vm14, %v675_v60, 0.0 }
 0x217   : > { %vm764_vm0 = vcmp.lt.s32.totalorder %v748_v59, 300  ;;  %v811_v52 = vsel %vm763_vm15, %v676_v4, 0.0 }
 0x218   : > { %v820_v45 = vadd.f32 %v819_v36, %v804_v29  ;;  %v812_v50 = vsel %vm764_vm0, %v677_v2, 0.0 }
 0x21a   : > { %v821_v42 = vadd.f32 %v820_v45, %v805_v35 }
 0x21c   : > { %v822_v49 = vadd.f32 %v821_v42, %v806_v41 }
 0x21e   : > { %v823_v46 = vadd.f32 %v822_v49, %v807_v53 }
 0x220   : > { %v824_v44 = vadd.f32 %v823_v46, %v808_v51 }
 0x222   : > { %v825_v57 = vadd.f32 %v824_v44, %v809_v48 }
 0x224   : > { %v826_v54 = vadd.f32 %v825_v57, %v810_v55 }
 0x226   : > { %v827_v62 = vadd.f32 %v826_v54, %v811_v52 }
 0x228   : > { %v828_v1 = vadd.f32 %v827_v62, %v812_v50 }
 0x22a   : > { %v829_v61 = vrot.slane %v828_v1, 4 }
 0x22c   : > { %v830_v63 = vadd.f32 %v829_v61, %v828_v1 }
 0x22e   : > { %v831_v5 = vrot.slane %v830_v63, 2 }
 0x230   : > { %v832_v6 = vadd.f32 %v831_v5, %v830_v63 }
 0x232   : > { %v833_v7 = vrot.slane %v832_v6, 1 }
 0x234   : > { %v834_v58 = vadd.f32 %v833_v7, %v832_v6 }
 0x236   : > { %v835_v60 = vadd.f32 %v834_v58, %v813_v8 }
 0x238   : > { %836 = vst [vmem:[%s1404_s24] sm:$0x1] %v835_v60 }
 0x239 PF: > { %s957_s9 = sshll.u32 %s1280_s19, 7  ;;  %s851_s10 = sshll.u32 %s1404_s24, 4  ;;  %s852_s10 = int_to_ptr.vmem [resolvable:$true] %s851_s10 }
 0x23a   : > { %s849_s7 = scalar_lea.hbm %s1694_s4, %s957_s9  ;;  %s838_s18 = scalar_lea.sflag [#allocation3], %s233_s6 }
 0x23b   : > { %s1200_s8 = scalar_lea.vmem %s852_s10, 128  ;;  %s1295_s11 = smov [#allocation2]  }
 0x23c   : > { %p1201_p4 = scmp.ne.s32.totalorder %s852_s10, %s1200_s8  ;;  %s1204_s12 = sshll.u32 %s1295_s11, 4  ;;  %s1205_s12 = int_to_ptr.vmem [resolvable:$false] %s1204_s12 }
 0x23d   : > { %s1206_s13 = scalar_lea.vmem %s1205_s12, 256  ;;  %p1207_p7 = scmp.lt.s32.totalorder %s852_s10, %s1205_s12 }
 0x23e   : > { %p1202_p5 = pnand %p1201_p4, %p1370_p3  ;;  %p1208_p8 = scmp.lt.s32.totalorder %s1206_s13, %s1200_s8 }
 0x240   : > { %p1203_p6 = pneg %p1202_p5  ;;  %p1209_p10 = por %p1208_p8, %p1207_p7 }
 0x242   : > { %p1210_p11 = pnand %p1209_p10, %p1203_p6 }
 0x244   : > { %1213 = shalt.err (!%p1210_p11)
}
 0x245   : > { %s1214_s19 = scalar_lea.hbm %s849_s7, 128  ;;  %s1218_s14 = scalar_lea.hbm %s1694_s4, 256 }
 0x246   : > { %p1215_p12 = scmp.ne.s32.totalorder %s849_s7, %s1214_s19  ;;  %p1219_p1 = scmp.lt.s32.totalorder %s849_s7, %s1694_s4 }
 0x247   : > { %p1220_p2 = scmp.lt.s32.totalorder %s1218_s14, %s1214_s19 }
 0x248   : > { %p1216_p13 = pnand %p1215_p12, %p1370_p3 }
 0x249   : > { %p1221_p4 = por %p1220_p2, %p1219_p1 }
 0x24a   : > { %p1217_p0 = pneg %p1216_p13 }
 0x24c   : > { %p1222_p5 = pnand %p1221_p4, %p1217_p0 }
 0x24e   : > { %1225 = shalt.err (!%p1222_p5)
}
 0x24f   : > { %1128 = dma.vmem_to_hbm [thread:$0]  (%p1370_p3), %s852_s10, 128, %s849_s7, %s838_s18  }
 0x250 PF: > { %p1134_p6 = scmp.ge.s32.totalorder %s1292_s22, 2  ;;  %s863_s29 = sand.u32 1, %s1264_s15  }
 0x251   : > { %s864_s30 = scalar_lea.sflag [#allocation3], %s863_s29 }
 0x252   : > { %p1131_p7 = pnand %p1134_p6, %p1380_p9 }
 0x254   : > { %p1132_p8 = pneg %p1131_p7 }
 0x256   : > { %1259 = dma.done.wait (%p1132_p8), %s864_s30, 128  }
 0x257   : > { %1261 = vsyncadd (%p1132_p8), %s864_s30, 4294967168  ;;  %s17_s22 = sadd.s32 1, %s1292_s22   ;;  %s1697_s15 = smov %s1268_s16 }
 0x258   : > { %p14_p10 = scmp.ge.s32.totalorder %s17_s22, 6   ;;  %s1698_s16 = smov %s1272_s17 }
 0x259   : > { %s1699_s17 = smov %s1388_s5  ;;  %s1700_s18 = smov %s1284_s20 }
 0x25a   : > { %s1701_s19 = smov %s1288_s21  ;;  %s1702_s20 = smov %s1705_s25 }
 0x25b   : > { %s1703_s21 = smov %s1709_s26  ;;  %16 = sbr.rel (!%p14_p10) target bundleno = 5 (0x5), region = 83 }
 0x260   :  { %869 = vsyncpa [#allocation3], 1 }
 0x261   :  { %871 = vsyncpa [#allocation3 + $0x1], 1 }

</bundles_post_ra>
